<compile_context>
chip_gen: v5e
topology: v5e:2x2
jax: 0.10.0
libtpu: 0.0.40
codegen_flags: <defaults>
</compile_context>

<pallas_src>
import jax
import jax.numpy as jnp
from jax.experimental import pallas as pl
from jax.experimental.pallas import tpu as pltpu


def _round_up(x, m):
    return ((x + m - 1) // m) * m


def _pick_tile(n, align, max_tile):
    """Largest tile (multiple of `align`, <= max_tile) minimizing padding of n."""
    n = max(int(n), 1)
    n_aligned = _round_up(n, align)
    if n_aligned <= max_tile:
        return n_aligned
    best_t, best_pad = align, None
    t = align
    while t <= max_tile:
        pad = _round_up(n, t) - n
        if best_pad is None or pad < best_pad or (pad == best_pad and t > best_t):
            best_t, best_pad = t, pad
        t += align
    return best_t


# ---------------------------------------------------------------------------
# Kernels
# ---------------------------------------------------------------------------

def _matmul_kernel_f32_out(x_ref, w_ref, o_ref):
    """K-major matmul, accumulating directly into the resident f32 output block."""
    @pl.when(pl.program_id(2) == 0)
    def _():
        o_ref[...] = jnp.zeros_like(o_ref)

    o_ref[...] += jnp.dot(x_ref[...], w_ref[...],
                          preferred_element_type=jnp.float32)


def _matmul_kernel_lowp_out(x_ref, w_ref, o_ref, acc_ref):
    """K-major matmul with f32 VMEM accumulator, cast to output dtype at the end."""
    @pl.when(pl.program_id(2) == 0)
    def _():
        acc_ref[...] = jnp.zeros_like(acc_ref)

    acc_ref[...] += jnp.dot(x_ref[...], w_ref[...],
                            preferred_element_type=jnp.float32)

    @pl.when(pl.program_id(2) == pl.num_programs(2) - 1)
    def _():
        o_ref[...] = acc_ref[...].astype(o_ref.dtype)


# ---------------------------------------------------------------------------
# Tiled, pipelined matmul:  out[M,P] = x2d[M,H] @ w_t[H,P]
# ---------------------------------------------------------------------------

def _pallas_matmul(x2d, w_t, out_dtype):
    M, H = x2d.shape
    H2, P = w_t.shape
    assert H == H2, (x2d.shape, w_t.shape)

    in_itemsize = jnp.dtype(x2d.dtype).itemsize
    out_itemsize = jnp.dtype(out_dtype).itemsize
    # Sublane packing: 8 rows/vreg for 32-bit, 16 for bf16, 32 for 8-bit dtypes.
    m_align = 8 if in_itemsize >= 4 else (16 if in_itemsize == 2 else 32)

    # --- adaptive tile selection (minimize padding, prefer large tiles) -----
    TM = _pick_tile(M, m_align, 512)
    Mp = _round_up(M, TM)
    m_grid = Mp // TM

    Pp128 = _round_up(P, 128)
    max_tn = 512
    if m_grid == 1 and Pp128 >= 256:
        # Keep >= 2 output-column tiles so both v7x TensorCores get work.
        max_tn = min(max_tn, max(128, (Pp128 // 2) // 128 * 128))
    TN = _pick_tile(P, 128, max_tn)
    Pp = _round_up(P, TN)

    Hp128 = _round_up(H, 128)
    TK = Hp128 if Hp128 <= 1024 else _pick_tile(H, 128, 1024)
    Hp = _round_up(H, TK)
    k_grid = Hp // TK

    # --- zero-pad to tile multiples (zero rows/cols along H are harmless) ---
    if (Mp, Hp) != (M, H):
        x2d = jnp.pad(x2d, ((0, Mp - M), (0, Hp - H)))
    if (Hp, Pp) != (H, P):
        w_t = jnp.pad(w_t, ((0, Hp - H), (0, Pp - P)))

    grid = (m_grid, Pp // TN, k_grid)

    # Truthful HBM-traffic estimate: X re-read once per P tile, W once per M tile.
    cost = pl.CostEstimate(
        flops=2 * Mp * Hp * Pp,
        transcendentals=0,
        bytes_accessed=(Mp * Hp * (Pp // TN) + Hp * Pp * m_grid) * in_itemsize
        + Mp * Pp * out_itemsize,
    )

    f32_out = jnp.dtype(out_dtype) == jnp.dtype(jnp.float32)
    if f32_out:
        kernel = _matmul_kernel_f32_out
        scratch = []
    else:
        kernel = _matmul_kernel_lowp_out
        scratch = [pltpu.VMEM((TM, TN), jnp.float32)]

    # Footprint-derived VMEM limit, capped at 48 MiB (v7x: 64 MiB per TC).
    footprint = (2 * (TM * TK + TK * TN) * in_itemsize
                 + 2 * TM * TN * out_itemsize
                 + (0 if f32_out else TM * TN * 4))
    vmem_limit = min(48 * 1024 * 1024, max(32 * 1024 * 1024, int(footprint * 2)))

    out = pl.pallas_call(
        kernel,
        out_shape=jax.ShapeDtypeStruct((Mp, Pp), out_dtype),
        grid_spec=pltpu.PrefetchScalarGridSpec(
            num_scalar_prefetch=0,
            grid=grid,
            in_specs=[
                pl.BlockSpec((TM, TK), lambda i, j, k: (i, k)),  # X tile
                pl.BlockSpec((TK, TN), lambda i, j, k: (k, j)),  # W.T tile (H, P)
            ],
            out_specs=pl.BlockSpec((TM, TN), lambda i, j, k: (i, j)),
            scratch_shapes=scratch,
        ),
        compiler_params=pltpu.CompilerParams(
            dimension_semantics=("parallel", "parallel", "arbitrary"),
            vmem_limit_bytes=vmem_limit,
        ),
        cost_estimate=cost,
    )(x2d, w_t)

    if (Mp, Pp) != (M, P):
        out = out[:M, :P]
    return out


# ---------------------------------------------------------------------------
# Module-level wrappers
# ---------------------------------------------------------------------------

# Problems below ~4 MFLOP: launch + per-grid-step overhead beats any kernel win.
_MIN_FLOPS_FOR_PALLAS = 1 << 22


def _default_compute_dtype(x_dtype):
    # bf16 compute (f32 accumulation) is the default for f32 inputs: ~4x MXU
    # rate on v6e/v7x and half the HBM/VMEM traffic.
    return jnp.bfloat16 if jnp.dtype(x_dtype) == jnp.dtype(jnp.float32) else x_dtype


def _project_with_wt(x, w_t, *, force_pallas=False):
    """out = x @ w_t  with w_t already (H, P) in the compute dtype."""
    orig_shape = x.shape
    H = orig_shape[-1]
    P = w_t.shape[1]
    out_dtype = x.dtype

    x2d = x.reshape(-1, H)
    M = x2d.shape[0]

    if not force_pallas and 2 * M * H * P < _MIN_FLOPS_FOR_PALLAS:
        out2d = jnp.dot(x2d.astype(w_t.dtype), w_t,
                        preferred_element_type=jnp.float32).astype(out_dtype)
        return out2d.reshape(*orig_shape[:-1], P)

    out2d = _pallas_matmul(x2d.astype(w_t.dtype), w_t, out_dtype)
    return out2d.reshape(*orig_shape[:-1], P)


class PallasProjection:
    """Equivalent of Projection with projection in {'learnable','adaptive_finetune','LSM'}.

    Caches the static weight ONCE as an (H, P) array in the compute dtype, so
    neither a transpose nor a cast of the weight is paid per forward call.
    """

    def __init__(self, weight, compute_dtype=None):
        weight = jnp.asarray(weight)           # (P, H), torch Linear convention
        self.projection_dim = weight.shape[0]
        self.compute_dtype = (_default_compute_dtype(weight.dtype)
                              if compute_dtype is None else compute_dtype)
        self.w_t = weight.T.astype(self.compute_dtype)   # (H, P), cached

    def get_output_dim(self):
        return self.projection_dim

    def __call__(self, x, force_pallas=False):
        return _project_with_wt(x, self.w_t, force_pallas=force_pallas)


def projection_forward(x, weight, *, compute_dtype=None, force_pallas=False):
    """Functional one-shot form of Projection.forward.

    x      : (..., H)
    weight : (P, H) torch nn.Linear convention, or None (projection=None => Identity).
    Prefer PallasProjection for repeated use (caches the transposed / cast weight).
    """
    if weight is None:                 # projection == None  =>  nn.Identity()
        return x
    weight = jnp.asarray(weight)
    orig_shape = x.shape
    H = orig_shape[-1]
    P = weight.shape[0]
    M = 1
    for d in orig_shape[:-1]:
        M *= int(d)

    if not force_pallas and 2 * M * H * P < _MIN_FLOPS_FOR_PALLAS:
        # Tiny projection: plain XLA matmul at full input precision.
        out2d = jax.lax.dot_general(
            x.reshape(-1, H), weight,
            dimension_numbers=(((1,), (1,)), ((), ())),
            preferred_element_type=jnp.float32,
        ).astype(x.dtype)
        return out2d.reshape(*orig_shape[:-1], P)

    cd = _default_compute_dtype(x.dtype) if compute_dtype is None else compute_dtype
    w_t = weight.T.astype(cd)          # one-time per call; cache via PallasProjection
    return _project_with_wt(x, w_t, force_pallas=force_pallas)


# TODO(synk): projection == 'LEN' with a per-batch M of shape (B, H, H') is a
# batched matmul; it has no dedicated Pallas path here (use jnp.matmul).


if __name__ == "__main__":
    # Small shapes consistent with the module's forward:
    #   B * L * H -> B * L * P   and   B * H -> B * P
    B, L, H = 2, 8, 32
    P = H  # projection_dim == 0  =>  projection_dim = input_embedding_size

    key = jax.random.PRNGKey(0)
    kx, kx2, kw = jax.random.split(key, 3)

    x_bl_h = jax.random.normal(kx, (B, L, H), dtype=jnp.float32)
    x_b_h = jax.random.normal(kx2, (B, H), dtype=jnp.float32)
    # Deterministic weight init matching Projection.reset(): N(0, 0.02)
    weight = 0.02 * jax.random.normal(kw, (P, H), dtype=jnp.float32)

    # Exactness check: force the Pallas path at small shapes with f32 compute.
    proj_f32 = PallasProjection(weight, compute_dtype=jnp.float32)
    out3 = proj_f32(x_bl_h, force_pallas=True)
    out2 = proj_f32(x_b_h, force_pallas=True)
    # Auto functional path (tiny problem -> plain XLA fallback, full precision).
    out3_auto = projection_forward(x_bl_h, weight)
    jax.block_until_ready((out3, out2, out3_auto))

    ref3 = jnp.einsum("blh,ph->blp", x_bl_h, weight)
    ref2 = jnp.einsum("bh,ph->bp", x_b_h, weight)
    assert out3.shape == (B, L, P) and out2.shape == (B, P)
    assert jnp.allclose(out3, ref3, atol=1e-5, rtol=1e-5)
    assert jnp.allclose(out2, ref2, atol=1e-5, rtol=1e-5)
    assert jnp.allclose(out3_auto, ref3, atol=1e-5, rtol=1e-5)

    # Moderately sized problem exercising the default bf16-compute path and the
    # multi-tile grid.  H=384 -> TK=384, P=384 -> TN=384, M=1024 -> TM=512:
    # zero padding waste, grid = (2, 1, 1).
    Mb, Hb, Pb = 1024, 384, 384
    kx3, kw2 = jax.random.split(jax.random.PRNGKey(1))
    xb = jax.random.normal(kx3, (Mb, Hb), dtype=jnp.float32)
    wb = 0.02 * jax.random.normal(kw2, (Pb, Hb), dtype=jnp.float32)

    proj_b = PallasProjection(wb)           # cached (H, P) bf16 weight
    outb = proj_b(xb)                       # bf16 compute, f32 accumulate, f32 out
    jax.block_until_ready(outb)
    refb_bf16 = jnp.einsum(
        "mh,ph->mp",
        xb.astype(jnp.bfloat16).astype(jnp.float32),
        wb.astype(jnp.bfloat16).astype(jnp.float32),
    )
    assert outb.shape == (Mb, Pb)
    assert jnp.allclose(outb, refb_bf16, atol=1e-2, rtol=1e-2)

    # Same shape, f32 compute Pallas path -> tight check against f32 reference.
    outb_f32 = PallasProjection(wb, compute_dtype=jnp.float32)(xb)
    jax.block_until_ready(outb_f32)
    refb_f32 = jnp.einsum("mh,ph->mp", xb, wb)
    assert jnp.allclose(outb_f32, refb_f32, atol=2e-3, rtol=2e-3)

    # bf16 inputs -> bf16 output dtype: exercises the scratch-accumulator kernel.
    xb_bf16 = xb.astype(jnp.bfloat16)
    outb_lowp = proj_b(xb_bf16)
    jax.block_until_ready(outb_lowp)
    assert outb_lowp.dtype == jnp.bfloat16 and outb_lowp.shape == (Mb, Pb)
    assert jnp.allclose(outb_lowp.astype(jnp.float32), refb_bf16,
                        atol=2e-2, rtol=2e-2)

    print("KERNEL_OK")
</pallas_src>

<mosaic_0001>
module attributes {stable_mosaic.version = 11 : i64} {
  func.func @_matmul_kernel_f32_out(%arg0: i32, %arg1: i32, %arg2: i32, %arg3: memref<16x128xf32, #tpu.memory_space<vmem>>, %arg4: memref<128x128xf32, #tpu.memory_space<vmem>>, %arg5: memref<16x128xf32, #tpu.memory_space<vmem>>) attributes {dimension_semantics = [#tpu.dimension_semantics<parallel>, #tpu.dimension_semantics<parallel>, #tpu.dimension_semantics<arbitrary>], iteration_bounds = array<i64: 1, 1, 1>, scalar_prefetch = 0 : i64, scratch_operands = 0 : i64, tpu.core_type = #tpu.core_type<tc>, window_params = [{transform_indices = @transform_0, window_bounds = array<i64: 16, 128>}, {transform_indices = @transform_1, window_bounds = array<i64: 128, 128>}, {transform_indices = @transform_2, window_bounds = array<i64: 16, 128>}]} {
    %c0_i32 = arith.constant 0 : i32
    %0 = arith.cmpi eq, %arg2, %c0_i32 : i32
    %1 = arith.extui %0 : i1 to i32
    %c0_i32_0 = arith.constant 0 : i32
    %2 = arith.cmpi ne, %1, %c0_i32_0 : i32
    scf.if %2 {
      %cst_8 = arith.constant 0.000000e+00 : f32
      %9 = vector.broadcast %cst_8 : f32 to vector<16x128xf32>
      %c0_9 = arith.constant 0 : index
      %c0_10 = arith.constant 0 : index
      %10 = vector.load %arg5[%c0_9, %c0_10] : memref<16x128xf32, #tpu.memory_space<vmem>>, vector<16x128xf32>
      tpu.vector_store %arg5[%c0_9, %c0_10], %9 {strides = array<i32>} : memref<16x128xf32, #tpu.memory_space<vmem>>, vector<16x128xf32>,
    } else {
    }
    %c0 = arith.constant 0 : index
    %c0_1 = arith.constant 0 : index
    %3 = vector.load %arg5[%c0, %c0_1] : memref<16x128xf32, #tpu.memory_space<vmem>>, vector<16x128xf32>
    %c0_2 = arith.constant 0 : index
    %c0_3 = arith.constant 0 : index
    %4 = vector.load %arg3[%c0_2, %c0_3] : memref<16x128xf32, #tpu.memory_space<vmem>>, vector<16x128xf32>
    %c0_4 = arith.constant 0 : index
    %c0_5 = arith.constant 0 : index
    %5 = vector.load %arg4[%c0_4, %c0_5] : memref<128x128xf32, #tpu.memory_space<vmem>>, vector<128x128xf32>
    %cst = arith.constant dense<0.000000e+00> : vector<16x128xf32>
    %6 = tpu.matmul %4, %5, %cst {dimension_numbers = #tpu.dot_dimension_numbers<[1], [0], [0], [1], [0, 0, 1, 1], [], []>} : vector<16x128xf32>, vector<128x128xf32>, vector<16x128xf32> -> vector<16x128xf32>
    %7 = arith.addf %3, %6 : vector<16x128xf32>
    %c0_6 = arith.constant 0 : index
    %c0_7 = arith.constant 0 : index
    %8 = vector.load %arg5[%c0_6, %c0_7] : memref<16x128xf32, #tpu.memory_space<vmem>>, vector<16x128xf32>
    tpu.vector_store %arg5[%c0_6, %c0_7], %7 {strides = array<i32>} : memref<16x128xf32, #tpu.memory_space<vmem>>, vector<16x128xf32>,
    return
  }
  func.func @transform_0(%arg0: i32, %arg1: i32, %arg2: i32) -> (i32, i32) {
    %c0_i32 = arith.constant 0 : i32
    return %arg0, %arg2 : i32, i32
  }
  func.func @transform_1(%arg0: i32, %arg1: i32, %arg2: i32) -> (i32, i32) {
    %c0_i32 = arith.constant 0 : i32
    return %arg2, %arg1 : i32, i32
  }
  func.func @transform_2(%arg0: i32, %arg1: i32, %arg2: i32) -> (i32, i32) {
    %c0_i32 = arith.constant 0 : i32
    return %arg0, %arg1 : i32, i32
  }
}

</mosaic_0001>

<bundles_post_ra>
// kernel: tpu_custom_call.1
= control target key start
LH: loop header
LB: loop body
LE: loop exit
PB: predicated region body
PF: predicated region fallthrough
CT: control target
= control target key end

     0   :  { %7 = vsyncpa [#allocation3], 0  ;;  %s255_s0 = inlined_call_operand.hbm [shape: f32[16,128], index: 0, kind: input, shape index: {}]   ;;  %s256_s1 = inlined_call_operand.hbm [shape: f32[128,128], index: 1, kind: input, shape index: {}]   ;;  %s257_s2 = inlined_call_operand.hbm [shape: f32[16,128], index: 2, kind: output, shape index: {}]  }
   0x1   :  { %8 = vsyncpa [#allocation6], 0 }
   0x2   :  { %9 = vsyncpa [#allocation4], 0  ;;  %s14_s11 = sshll.u32 %s255_s0, 4  ;;  %s217_s12 = smov [#allocation2]   ;;  %s15_s11 = int_to_ptr.hbm [resolvable:$true] %s14_s11 }
   0x3   :  { %s16_s13 = sshll.u32 %s217_s12, 4  ;;  %s27_s16 = sshll.u32 %s256_s1, 4  ;;  %s17_s13 = int_to_ptr.vmem [resolvable:$true] %s16_s13  ;;  %s28_s16 = int_to_ptr.hbm [resolvable:$true] %s27_s16 }
   0x4   :  { %s218_s17 = smov 128   ;;  %s219_s18 = smov 8  }
   0x5   :  { %22 = dma.hbm_to_vmem [thread:$0]  %s15_s11, 256, %s17_s13, [#allocation3], %s218_s17, %s218_s17, %s219_s18  }
   0x6   :  { %s220_s19 = smov [#allocation5]  }
   0x7   :  { %s29_s20 = sshll.u32 %s220_s19, 4  ;;  %s30_s20 = int_to_ptr.vmem [resolvable:$true] %s29_s20 }
   0x8   :  { %35 = dma.hbm_to_vmem [thread:$0]  %s28_s16, 2048, %s30_s20, [#allocation6], %s218_s17, %s218_s17, %s219_s18  }
   0x9   :  { %211 = dma.done.wait [#allocation3], 256  }
   0xa   :  { %212 = vsyncadd [#allocation3], 4294967040 }
   0xb   :  { %213 = dma.done.wait [#allocation6], 2048  }
   0xc   :  { %214 = vsyncadd [#allocation6], 4294965248  ;;  %v69_v0 = vld [vmem:[#allocation5 + $0x78] sm:$0xff]  ;;  %v68_v1 = vld [vmem:[#allocation5 + $0x70] sm:$0xff]  ;;  %s221_s0 = smov [#allocation7]   ;;  %s103_s23 = sshll.u32 %s257_s2, 4  ;;  %s104_s23 = int_to_ptr.hbm [resolvable:$true] %s103_s23 }
   0xd   :  { %70 = vmatpush.msra.mxu0 %v69_v0  ;;  %117 = vmatpush.msra.mxu1 %v69_v0  ;;  %v67_v2 = vld [vmem:[#allocation5 + $0x68] sm:$0xff]  ;;  %v66_v3 = vld [vmem:[#allocation5 + $0x60] sm:$0xff]  ;;  %v65_v4 = vld [vmem:[#allocation5 + $0x58] sm:$0xff]  ;;  %s101_s1 = sshll.u32 %s221_s0, 4  ;;  %s102_s1 = int_to_ptr.vmem [resolvable:$true] %s101_s1 }
   0xe   :  { %v64_v5 = vld [vmem:[#allocation5 + $0x50] sm:$0xff]  ;;  %v63_v6 = vld [vmem:[#allocation5 + $0x48] sm:$0xff]  ;;  %v62_v7 = vld [vmem:[#allocation5 + $0x40] sm:$0xff] }
   0xf   :  { %71 = vmatpush.msra.mxu0 %v68_v1  ;;  %118 = vmatpush.msra.mxu1 %v68_v1  ;;  %v61_v8 = vld [vmem:[#allocation5 + $0x38] sm:$0xff]  ;;  %v60_v9 = vld [vmem:[#allocation5 + $0x30] sm:$0xff]  ;;  %v59_v10 = vld [vmem:[#allocation5 + $0x28] sm:$0xff] }
  0x10   :  { %v58_v11 = vld [vmem:[#allocation5 + $0x20] sm:$0xff]  ;;  %v57_v12 = vld [vmem:[#allocation5 + $0x18] sm:$0xff]  ;;  %v56_v13 = vld [vmem:[#allocation5 + $0x10] sm:$0xff] }
  0x11   :  { %72 = vmatpush.msra.mxu0 %v67_v2  ;;  %119 = vmatpush.msra.mxu1 %v67_v2  ;;  %v55_v14 = vld [vmem:[#allocation5 + $0x8] sm:$0xff]  ;;  %v54_v15 = vld [vmem:[#allocation5] sm:$0xff]  ;;  %v52_v16 = vld [vmem:[#allocation2] sm:$0xff] }
  0x12   :  { %v53_v17 = vld [vmem:[#allocation2 + $0x8] sm:$0xff] }
  0x13   :  { %73 = vmatpush.msra.mxu0 %v66_v3  ;;  %120 = vmatpush.msra.mxu1 %v66_v3 }
  0x15   :  { %74 = vmatpush.msra.mxu0 %v65_v4  ;;  %121 = vmatpush.msra.mxu1 %v65_v4 }
  0x17   :  { %75 = vmatpush.msra.mxu0 %v64_v5  ;;  %122 = vmatpush.msra.mxu1 %v64_v5 }
  0x19   :  { %76 = vmatpush.msra.mxu0 %v63_v6  ;;  %123 = vmatpush.msra.mxu1 %v63_v6 }
  0x1b   :  { %77 = vmatpush.msra.mxu0 %v62_v7  ;;  %124 = vmatpush.msra.mxu1 %v62_v7 }
  0x1d   :  { %78 = vmatpush.msra.mxu0 %v61_v8  ;;  %125 = vmatpush.msra.mxu1 %v61_v8 }
  0x1f   :  { %79 = vmatpush.msra.mxu0 %v60_v9  ;;  %126 = vmatpush.msra.mxu1 %v60_v9 }
  0x21   :  { %80 = vmatpush.msra.mxu0 %v59_v10  ;;  %127 = vmatpush.msra.mxu1 %v59_v10 }
  0x23   :  { %81 = vmatpush.msra.mxu0 %v58_v11  ;;  %128 = vmatpush.msra.mxu1 %v58_v11 }
  0x25   :  { %82 = vmatpush.msra.mxu0 %v57_v12  ;;  %129 = vmatpush.msra.mxu1 %v57_v12 }
  0x27   :  { %83 = vmatpush.msra.mxu0 %v56_v13  ;;  %130 = vmatpush.msra.mxu1 %v56_v13 }
  0x29   :  { %84 = vmatpush.msra.mxu0 %v55_v14  ;;  %131 = vmatpush.msra.mxu1 %v55_v14 }
  0x2b   :  { %85 = vmatpush.msra.mxu0 %v54_v15  ;;  %132 = vmatpush.msra.mxu1 %v54_v15 }
  0x2c   :  { %86 = vmatmul.f32.vlgmr.msra.gmra.mxu0 %v52_v16  ;;  %89 = vmatmul.f32.vlgmr.msra.gmra.mxu1 %v53_v17 }
  0xa9   :  { %v87_v18 = vpop.f32.mrf.mxu0  ;;  %v90_v19 = vpop.f32.mrf.mxu1 }
  0xaa   :  { %95 = vst [vmem:[#allocation7] sm:$0xff] %v87_v18 }
  0xab   :  { %96 = vst [vmem:[#allocation7 + $0x8] sm:$0xff] %v90_v19 }
  0xac   :  { %109 = dma.vmem_to_hbm [thread:$0]  %s102_s1, 256, %s104_s23, [#allocation4], %s218_s17, %s218_s17, %s219_s18  }
  0xad   :  { %215 = dma.done.wait [#allocation4], 256  }
  0xae   :  { %216 = vsyncadd [#allocation4], 4294967040 }
  0xaf   :  { %114 = vsyncpa [#allocation3], 1 }
  0xb0   :  { %115 = vsyncpa [#allocation6], 1 }
  0xb1   :  { %116 = vsyncpa [#allocation4], 1 }

</bundles_post_ra>
